<compile_context>
chip_gen: v6e
topology: v6e:2x2x1
jax: 0.10.0
libtpu: 0.0.40
codegen_flags: <defaults>
</compile_context>

<pallas_src>
import jax
import jax.numpy as jnp
from jax.experimental import pallas as pl
from jax.experimental.pallas import tpu as pltpu


def ffn_kernel(x_ref, w1_ref, b1_ref, w2_ref, b2_ref, g_ref, beta_ref,
               o_ref, acc_ref):
    k = pl.program_id(1)

    @pl.when(k == 0)
    def _init():
        acc_ref[...] = jnp.zeros_like(acc_ref)

    # ---- matmul path in bf16, accumulate in f32 -------------------------
    x_bf = x_ref[...].astype(jnp.bfloat16)                      # (tm, d_in)

    # w_1 chunk: Linear(d_in, tk) + bias + ReLU
    h = jnp.dot(x_bf, w1_ref[...], preferred_element_type=jnp.float32)
    h = jnp.maximum(h + b1_ref[...], 0.0)                       # (tm, tk) f32

    # w_2 chunk: partial Linear(tk, d_in), accumulated over k
    acc_ref[...] += jnp.dot(h.astype(jnp.bfloat16), w2_ref[...],
                            preferred_element_type=jnp.float32)  # (tm, d_in)

    # ---- epilogue (bias + residual + LayerNorm) in f32 ------------------
    @pl.when(k == pl.num_programs(1) - 1)
    def _finalize():
        x_f32 = x_ref[...].astype(jnp.float32)
        # TODO(synk): dropout implemented as identity (inference semantics);
        # training-mode dropout with PyTorch RNG has no exact Pallas equivalent.
        y = acc_ref[...] + b2_ref[...] + x_f32                   # bias + residual
        mean = jnp.mean(y, axis=-1, keepdims=True)
        var = jnp.mean((y - mean) ** 2, axis=-1, keepdims=True)
        y = (y - mean) * jax.lax.rsqrt(var + 1e-6)
        o_ref[...] = (y * g_ref[...] + beta_ref[...]).astype(o_ref.dtype)


def position_wise_ffn(x, w1, b1, w2, b2, gamma, beta, *, tm=256, tk=512):
    """x: (B, S, d_in) float32. Weights stored as (in, out) for row-major matmul."""
    B, S, d_in = x.shape
    d_hid = w1.shape[1]
    M = B * S

    # Row tiling: clamp to M for small inputs, pad M up to a tile multiple.
    tm = min(tm, M)
    n_m = pl.cdiv(M, tm)
    M_pad = n_m * tm
    x2 = x.reshape(M, d_in).astype(jnp.float32)
    if M_pad != M:
        x2 = jnp.pad(x2, ((0, M_pad - M), (0, 0)))

    # K tiling over d_hid (reduction axis); fall back to no tiling if it
    # doesn't divide cleanly or d_hid is small.
    if tk >= d_hid or d_hid % tk != 0:
        tk = d_hid
    n_k = d_hid // tk

    # Cast matmul weights to bf16 (halves VMEM/HBM traffic, full MXU rate).
    w1b = w1.astype(jnp.bfloat16)
    w2b = w2.astype(jnp.bfloat16)
    # Biases / LN params stay f32 as (1, dim) rows for clean lane layout.
    b1_2 = b1.reshape(1, d_hid).astype(jnp.float32)
    b2_2 = b2.reshape(1, d_in).astype(jnp.float32)
    g_2 = gamma.reshape(1, d_in).astype(jnp.float32)
    bt_2 = beta.reshape(1, d_in).astype(jnp.float32)

    # Explicit VMEM budget (double-buffered tiles + weight blocks + scratch).
    f32b, bf16b = 4, 2
    est = (2 * tm * d_in * f32b          # x tile (double-buffered)
           + 2 * tm * d_in * f32b        # out tile (double-buffered)
           + 2 * d_in * tk * bf16b       # w1 block
           + 2 * tk * d_in * bf16b       # w2 block
           + tm * d_in * f32b            # f32 accumulator scratch
           + tm * tk * f32b              # hidden activation chunk
           + 2 * (tk + 3 * d_in) * f32b) # biases / gamma / beta
    vmem_limit = max(32 << 20, min(int(1.5 * est) + (4 << 20), 64 << 20))

    out = pl.pallas_call(
        ffn_kernel,
        out_shape=jax.ShapeDtypeStruct((M_pad, d_in), x.dtype),
        grid_spec=pltpu.PrefetchScalarGridSpec(
            num_scalar_prefetch=0,
            grid=(n_m, n_k),                                    # rows, d_hid chunks
            in_specs=[
                pl.BlockSpec((tm, d_in), lambda i, k: (i, 0)),   # x tile
                pl.BlockSpec((d_in, tk), lambda i, k: (0, k)),   # w1 chunk
                pl.BlockSpec((1, tk), lambda i, k: (0, k)),      # b1 chunk
                pl.BlockSpec((tk, d_in), lambda i, k: (k, 0)),   # w2 chunk
                pl.BlockSpec((1, d_in), lambda i, k: (0, 0)),    # b2
                pl.BlockSpec((1, d_in), lambda i, k: (0, 0)),    # gamma
                pl.BlockSpec((1, d_in), lambda i, k: (0, 0)),    # beta
            ],
            out_specs=pl.BlockSpec((tm, d_in), lambda i, k: (i, 0)),
            scratch_shapes=[pltpu.VMEM((tm, d_in), jnp.float32)],
        ),
        compiler_params=pltpu.CompilerParams(
            dimension_semantics=("parallel", "arbitrary"),
            vmem_limit_bytes=vmem_limit,
        ),
    )(x2, w1b, b1_2, w2b, b2_2, g_2, bt_2)

    return out[:M].reshape(B, S, d_in)


def _ref_matched_precision(x, w1, b1, w2, b2, gamma, beta):
    """Reference with the same bf16-matmul / f32-epilogue precision as the kernel."""
    xb = x.astype(jnp.bfloat16)
    h = jnp.dot(xb, w1.astype(jnp.bfloat16),
                preferred_element_type=jnp.float32) + b1
    h = jnp.maximum(h, 0.0)
    y = jnp.dot(h.astype(jnp.bfloat16), w2.astype(jnp.bfloat16),
                preferred_element_type=jnp.float32) + b2
    y = y + x
    mean = jnp.mean(y, axis=-1, keepdims=True)
    var = jnp.mean((y - mean) ** 2, axis=-1, keepdims=True)
    return (y - mean) / jnp.sqrt(var + 1e-6) * gamma + beta


def _ref_f32(x, w1, b1, w2, b2, gamma, beta):
    h = jnp.maximum(x @ w1 + b1, 0.0)
    y = h @ w2 + b2
    y = y + x
    mean = jnp.mean(y, axis=-1, keepdims=True)
    var = jnp.mean((y - mean) ** 2, axis=-1, keepdims=True)
    return (y - mean) / jnp.sqrt(var + 1e-6) * gamma + beta


if __name__ == "__main__":
    # Small but lane-dense demo shapes (feature dims multiples of 128).
    B, S, d_in, d_hid = 2, 8, 128, 256
    key = jax.random.PRNGKey(0)
    kx, k1, k2, k3, k4 = jax.random.split(key, 5)

    x = jax.random.normal(kx, (B, S, d_in), dtype=jnp.float32)

    # nn.Linear-style init: U(-1/sqrt(fan_in), 1/sqrt(fan_in)); stored as (in, out)
    lim1 = 1.0 / (d_in ** 0.5)
    lim2 = 1.0 / (d_hid ** 0.5)
    w1 = jax.random.uniform(k1, (d_in, d_hid), jnp.float32, -lim1, lim1)
    b1 = jax.random.uniform(k2, (d_hid,), jnp.float32, -lim1, lim1)
    w2 = jax.random.uniform(k3, (d_hid, d_in), jnp.float32, -lim2, lim2)
    b2 = jax.random.uniform(k4, (d_in,), jnp.float32, -lim2, lim2)
    gamma = jnp.ones((d_in,), jnp.float32)
    beta = jnp.zeros((d_in,), jnp.float32)

    out = position_wise_ffn(x, w1, b1, w2, b2, gamma, beta)
    out = jax.block_until_ready(out)

    # Tight check against a precision-matched reference (bf16 matmuls, f32 LN).
    ref_bf = _ref_matched_precision(x, w1, b1, w2, b2, gamma, beta)
    assert jnp.allclose(out, ref_bf, atol=2e-3, rtol=2e-3), "mismatch vs bf16 ref"

    # Loose sanity check against the pure-f32 PyTorch-equivalent math.
    ref32 = _ref_f32(x, w1, b1, w2, b2, gamma, beta)
    assert jnp.allclose(out, ref32, atol=3e-2, rtol=3e-2), "mismatch vs f32 ref"

    print("KERNEL_OK")
</pallas_src>

<mosaic_0001>
module attributes {stable_mosaic.version = 11 : i64} {
  func.func @ffn_kernel(%arg0: i32, %arg1: i32, %arg2: memref<16x128xf32, #tpu.memory_space<vmem>>, %arg3: memref<128x256xbf16, #tpu.memory_space<vmem>>, %arg4: memref<1x256xf32, #tpu.memory_space<vmem>>, %arg5: memref<256x128xbf16, #tpu.memory_space<vmem>>, %arg6: memref<1x128xf32, #tpu.memory_space<vmem>>, %arg7: memref<1x128xf32, #tpu.memory_space<vmem>>, %arg8: memref<1x128xf32, #tpu.memory_space<vmem>>, %arg9: memref<16x128xf32, #tpu.memory_space<vmem>>, %arg10: memref<16x128xf32, #tpu.memory_space<vmem>>) attributes {dimension_semantics = [#tpu.dimension_semantics<parallel>, #tpu.dimension_semantics<arbitrary>], iteration_bounds = array<i64: 1, 1>, scalar_prefetch = 0 : i64, scratch_operands = 1 : i64, tpu.core_type = #tpu.core_type<tc>, window_params = [{transform_indices = @transform_0, window_bounds = array<i64: 16, 128>}, {transform_indices = @transform_1, window_bounds = array<i64: 128, 256>}, {transform_indices = @transform_2, window_bounds = array<i64: 1, 256>}, {transform_indices = @transform_3, window_bounds = array<i64: 256, 128>}, {pipeline_mode = #tpu.pipeline_mode<synchronous>, transform_indices = @transform_4, window_bounds = array<i64: 1, 128>}, {pipeline_mode = #tpu.pipeline_mode<synchronous>, transform_indices = @transform_5, window_bounds = array<i64: 1, 128>}, {pipeline_mode = #tpu.pipeline_mode<synchronous>, transform_indices = @transform_6, window_bounds = array<i64: 1, 128>}, {transform_indices = @transform_7, window_bounds = array<i64: 16, 128>}]} {
    %c0_i32 = arith.constant 0 : i32
    %0 = arith.cmpi eq, %arg1, %c0_i32 : i32
    %1 = arith.extui %0 : i1 to i32
    %c0_i32_0 = arith.constant 0 : i32
    %2 = arith.cmpi ne, %1, %c0_i32_0 : i32
    scf.if %2 {
      %cst_16 = arith.constant 0.000000e+00 : f32
      %21 = vector.broadcast %cst_16 : f32 to vector<16x128xf32>
      %c0_17 = arith.constant 0 : index
      %c0_18 = arith.constant 0 : index
      %22 = vector.load %arg10[%c0_17, %c0_18] : memref<16x128xf32, #tpu.memory_space<vmem>>, vector<16x128xf32>
      tpu.vector_store %arg10[%c0_17, %c0_18], %21 {strides = array<i32>} : memref<16x128xf32, #tpu.memory_space<vmem>>, vector<16x128xf32>,
    } else {
    }
    %c0 = arith.constant 0 : index
    %c0_1 = arith.constant 0 : index
    %3 = vector.load %arg2[%c0, %c0_1] : memref<16x128xf32, #tpu.memory_space<vmem>>, vector<16x128xf32>
    %4 = arith.truncf %3 : vector<16x128xf32> to vector<16x128xbf16>
    %c0_2 = arith.constant 0 : index
    %c0_3 = arith.constant 0 : index
    %5 = vector.load %arg3[%c0_2, %c0_3] : memref<128x256xbf16, #tpu.memory_space<vmem>>, vector<128x256xbf16>
    %cst = arith.constant dense<0.000000e+00> : vector<16x256xf32>
    %6 = tpu.matmul %4, %5, %cst {dimension_numbers = #tpu.dot_dimension_numbers<[1], [0], [0], [1], [0, 0, 1, 1], [], []>} : vector<16x128xbf16>, vector<128x256xbf16>, vector<16x256xf32> -> vector<16x256xf32>
    %c0_4 = arith.constant 0 : index
    %c0_5 = arith.constant 0 : index
    %7 = vector.load %arg4[%c0_4, %c0_5] : memref<1x256xf32, #tpu.memory_space<vmem>>, vector<1x256xf32>
    %8 = vector.broadcast %7 : vector<1x256xf32> to vector<16x256xf32>
    %9 = arith.addf %6, %8 : vector<16x256xf32>
    %cst_6 = arith.constant 0.000000e+00 : f32
    %10 = vector.broadcast %cst_6 : f32 to vector<16x256xf32>
    %11 = arith.maximumf %9, %10 : vector<16x256xf32>
    %c0_7 = arith.constant 0 : index
    %c0_8 = arith.constant 0 : index
    %12 = vector.load %arg10[%c0_7, %c0_8] : memref<16x128xf32, #tpu.memory_space<vmem>>, vector<16x128xf32>
    %13 = arith.truncf %11 : vector<16x256xf32> to vector<16x256xbf16>
    %c0_9 = arith.constant 0 : index
    %c0_10 = arith.constant 0 : index
    %14 = vector.load %arg5[%c0_9, %c0_10] : memref<256x128xbf16, #tpu.memory_space<vmem>>, vector<256x128xbf16>
    %cst_11 = arith.constant dense<0.000000e+00> : vector<16x128xf32>
    %15 = tpu.matmul %13, %14, %cst_11 {dimension_numbers = #tpu.dot_dimension_numbers<[1], [0], [0], [1], [0, 0, 1, 1], [], []>} : vector<16x256xbf16>, vector<256x128xbf16>, vector<16x128xf32> -> vector<16x128xf32>
    %16 = arith.addf %12, %15 : vector<16x128xf32>
    %c0_12 = arith.constant 0 : index
    %c0_13 = arith.constant 0 : index
    %17 = vector.load %arg10[%c0_12, %c0_13] : memref<16x128xf32, #tpu.memory_space<vmem>>, vector<16x128xf32>
    tpu.vector_store %arg10[%c0_12, %c0_13], %16 {strides = array<i32>} : memref<16x128xf32, #tpu.memory_space<vmem>>, vector<16x128xf32>,
    %c0_i32_14 = arith.constant 0 : i32
    %18 = arith.cmpi eq, %arg1, %c0_i32_14 : i32
    %19 = arith.extui %18 : i1 to i32
    %c0_i32_15 = arith.constant 0 : i32
    %20 = arith.cmpi ne, %19, %c0_i32_15 : i32
    scf.if %20 {
      %c0_16 = arith.constant 0 : index
      %c0_17 = arith.constant 0 : index
      %21 = vector.load %arg2[%c0_16, %c0_17] : memref<16x128xf32, #tpu.memory_space<vmem>>, vector<16x128xf32>
      %c0_18 = arith.constant 0 : index
      %c0_19 = arith.constant 0 : index
      %22 = vector.load %arg10[%c0_18, %c0_19] : memref<16x128xf32, #tpu.memory_space<vmem>>, vector<16x128xf32>
      %c0_20 = arith.constant 0 : index
      %c0_21 = arith.constant 0 : index
      %23 = vector.load %arg6[%c0_20, %c0_21] : memref<1x128xf32, #tpu.memory_space<vmem>>, vector<1x128xf32>
      %24 = vector.broadcast %23 : vector<1x128xf32> to vector<16x128xf32>
      %25 = arith.addf %22, %24 : vector<16x128xf32>
      %26 = arith.addf %25, %21 : vector<16x128xf32>
      %cst_22 = arith.constant dense<0.000000e+00> : vector<16xf32>
      %27 = vector.multi_reduction <add>, %26, %cst_22 [1] : vector<16x128xf32> to vector<16xf32>
      %28 = vector.shape_cast %27 : vector<16xf32> to vector<16x1xf32>
      %cst_23 = arith.constant 1.280000e+02 : f32
      %29 = vector.broadcast %cst_23 : f32 to vector<16x1xf32>
      %30 = arith.divf %28, %29 : vector<16x1xf32>
      %31 = vector.broadcast %30 : vector<16x1xf32> to vector<16x128xf32>
      %32 = arith.subf %26, %31 : vector<16x128xf32>
      %33 = arith.mulf %32, %32 : vector<16x128xf32>
      %cst_24 = arith.constant dense<0.000000e+00> : vector<16xf32>
      %34 = vector.multi_reduction <add>, %33, %cst_24 [1] : vector<16x128xf32> to vector<16xf32>
      %35 = vector.shape_cast %34 : vector<16xf32> to vector<16x1xf32>
      %cst_25 = arith.constant 1.280000e+02 : f32
      %36 = vector.broadcast %cst_25 : f32 to vector<16x1xf32>
      %37 = arith.divf %35, %36 : vector<16x1xf32>
      %38 = vector.broadcast %30 : vector<16x1xf32> to vector<16x128xf32>
      %39 = arith.subf %26, %38 : vector<16x128xf32>
      %cst_26 = arith.constant 9.99999997E-7 : f32
      %40 = vector.broadcast %cst_26 : f32 to vector<16x1xf32>
      %41 = arith.addf %37, %40 : vector<16x1xf32>
      %42 = math.rsqrt %41 : vector<16x1xf32>
      %43 = vector.broadcast %42 : vector<16x1xf32> to vector<16x128xf32>
      %44 = arith.mulf %39, %43 : vector<16x128xf32>
      %c0_27 = arith.constant 0 : index
      %c0_28 = arith.constant 0 : index
      %45 = vector.load %arg7[%c0_27, %c0_28] : memref<1x128xf32, #tpu.memory_space<vmem>>, vector<1x128xf32>
      %46 = vector.broadcast %45 : vector<1x128xf32> to vector<16x128xf32>
      %47 = arith.mulf %44, %46 : vector<16x128xf32>
      %c0_29 = arith.constant 0 : index
      %c0_30 = arith.constant 0 : index
      %48 = vector.load %arg8[%c0_29, %c0_30] : memref<1x128xf32, #tpu.memory_space<vmem>>, vector<1x128xf32>
      %49 = vector.broadcast %48 : vector<1x128xf32> to vector<16x128xf32>
      %50 = arith.addf %47, %49 : vector<16x128xf32>
      %c0_31 = arith.constant 0 : index
      %c0_32 = arith.constant 0 : index
      %51 = vector.load %arg9[%c0_31, %c0_32] : memref<16x128xf32, #tpu.memory_space<vmem>>, vector<16x128xf32>
      tpu.vector_store %arg9[%c0_31, %c0_32], %50 {strides = array<i32>} : memref<16x128xf32, #tpu.memory_space<vmem>>, vector<16x128xf32>,
    } else {
    }
    return
  }
  func.func @transform_0(%arg0: i32, %arg1: i32) -> (i32, i32) {
    %c0_i32 = arith.constant 0 : i32
    %c0_i32_0 = arith.constant 0 : i32
    return %arg0, %c0_i32 : i32, i32
  }
  func.func @transform_1(%arg0: i32, %arg1: i32) -> (i32, i32) {
    %c0_i32 = arith.constant 0 : i32
    %c0_i32_0 = arith.constant 0 : i32
    return %c0_i32, %arg1 : i32, i32
  }
  func.func @transform_2(%arg0: i32, %arg1: i32) -> (i32, i32) {
    %c0_i32 = arith.constant 0 : i32
    %c0_i32_0 = arith.constant 0 : i32
    return %c0_i32, %arg1 : i32, i32
  }
  func.func @transform_3(%arg0: i32, %arg1: i32) -> (i32, i32) {
    %c0_i32 = arith.constant 0 : i32
    %c0_i32_0 = arith.constant 0 : i32
    return %arg1, %c0_i32 : i32, i32
  }
  func.func @transform_4(%arg0: i32, %arg1: i32) -> (i32, i32) {
    %c0_i32 = arith.constant 0 : i32
    %c0_i32_0 = arith.constant 0 : i32
    %c0_i32_1 = arith.constant 0 : i32
    return %c0_i32, %c0_i32_0 : i32, i32
  }
  func.func @transform_5(%arg0: i32, %arg1: i32) -> (i32, i32) {
    %c0_i32 = arith.constant 0 : i32
    %c0_i32_0 = arith.constant 0 : i32
    %c0_i32_1 = arith.constant 0 : i32
    return %c0_i32, %c0_i32_0 : i32, i32
  }
  func.func @transform_6(%arg0: i32, %arg1: i32) -> (i32, i32) {
    %c0_i32 = arith.constant 0 : i32
    %c0_i32_0 = arith.constant 0 : i32
    %c0_i32_1 = arith.constant 0 : i32
    return %c0_i32, %c0_i32_0 : i32, i32
  }
  func.func @transform_7(%arg0: i32, %arg1: i32) -> (i32, i32) {
    %c0_i32 = arith.constant 0 : i32
    %c0_i32_0 = arith.constant 0 : i32
    return %arg0, %c0_i32 : i32, i32
  }
}

</mosaic_0001>

<bundles_post_ra>
// kernel: tpu_custom_call.1
= control target key start
LH: loop header
LB: loop body
LE: loop exit
PB: predicated region body
PF: predicated region fallthrough
CT: control target
= control target key end

     0   :  { %12 = vsyncpa [#allocation4], 0  ;;  %s767_s0 = inlined_call_operand.hbm [shape: f32[16,128], index: 0, kind: input, shape index: {}]   ;;  %s768_s1 = inlined_call_operand.hbm [shape: bf16[128,256], index: 1, kind: input, shape index: {}]   ;;  %s769_s2 = inlined_call_operand.vmem [shape: f32[1,256], index: 2, kind: input, shape index: {}]   ;;  %s770_s3 = inlined_call_operand.hbm [shape: bf16[256,128], index: 3, kind: input, shape index: {}]   ;;  %s771_s4 = inlined_call_operand.vmem [shape: f32[1,128], index: 4, kind: input, shape index: {}]   ;;  %s772_s5 = inlined_call_operand.vmem [shape: f32[1,128], index: 5, kind: input, shape index: {}]   ;;  %s773_s6 = inlined_call_operand.vmem [shape: f32[1,128], index: 6, kind: input, shape index: {}]   ;;  %s774_s7 = inlined_call_operand.hbm [shape: f32[16,128], index: 7, kind: output, shape index: {}]  }
   0x1   :  { %13 = vsyncpa [#allocation7], 0 }
   0x2   :  { %14 = vsyncpa [#allocation5], 0  ;;  %s685_s24 = smov [#allocation6]   ;;  %s686_s26 = smov [#allocation3]  }
   0x3   :  { %s32_s25 = sshll.u32 %s685_s24, 4  ;;  %s20_s27 = sshll.u32 %s686_s26, 4  ;;  %s33_s25 = int_to_ptr.vmem [resolvable:$true] %s32_s25  ;;  %s21_s27 = int_to_ptr.vmem [resolvable:$true] %s20_s27 }
   0x4   :  { %s607_s28 = scalar_lea.vmem %s33_s25, 2048  ;;  %p612_p1 = scmp.lt.s32.totalorder %s33_s25, %s33_s25 }
   0x5   :  { %p608_p0 = scmp.ne.s32.totalorder %s33_s25, %s607_s28  ;;  %p613_p2 = scmp.lt.s32.totalorder %s607_s28, %s607_s28 }
   0x7   :  { %p614_p3 = por %p613_p2, %p612_p1 }
   0x9   :  { %p615_p4 = pnand %p614_p3, %p608_p0 }
   0xb   :  { %618 = shalt.err (!%p615_p4)
}
   0xc   :  { %s687_s29 = smov 128   ;;  %s688_s30 = smov 8  }
   0xd   :  { %38 = dma.hbm_to_vmem [thread:$0]  %s768_s1, 2048, %s33_s25, [#allocation7], %s687_s29, %s687_s29, %s688_s30  }
   0xe   :  { %s627_s10 = scalar_lea.vmem %s21_s27, 256  ;;  %p632_p6 = scmp.lt.s32.totalorder %s21_s27, %s21_s27 }
   0xf   :  { %p628_p5 = scmp.ne.s32.totalorder %s21_s27, %s627_s10  ;;  %p633_p7 = scmp.lt.s32.totalorder %s627_s10, %s627_s10 }
  0x11   :  { %p634_p8 = por %p633_p7, %p632_p6 }
  0x13   :  { %p635_p9 = pnand %p634_p8, %p628_p5 }
  0x15   :  { %638 = shalt.err (!%p635_p9)
}
  0x16   :  { %26 = dma.hbm_to_vmem [thread:$0]  %s767_s0, 256, %s21_s27, [#allocation4], %s687_s29, %s687_s29, %s688_s30  }
  0x17   :  { %s689_s13 = smov [#allocation8]  }
  0x18   :  { %s46_s14 = sshll.u32 %s689_s13, 4  ;;  %s47_s14 = int_to_ptr.vmem [resolvable:$true] %s46_s14 }
  0x19   :  { %s647_s15 = scalar_lea.vmem %s47_s14, 2048  ;;  %p652_p11 = scmp.lt.s32.totalorder %s47_s14, %s47_s14 }
  0x1a   :  { %p648_p10 = scmp.ne.s32.totalorder %s47_s14, %s647_s15  ;;  %p653_p12 = scmp.lt.s32.totalorder %s647_s15, %s647_s15 }
  0x1c   :  { %p654_p13 = por %p653_p12, %p652_p11 }
  0x1e   :  { %p655_p0 = pnand %p654_p13, %p648_p10 }
  0x20   :  { %658 = shalt.err (!%p655_p0)
}
  0x21   :  { %s690_s1 = smov 64   ;;  %s691_s16 = smov 4  }
  0x22   :  { %52 = dma.hbm_to_vmem [thread:$0]  %s770_s3, 2048, %s47_s14, [#allocation7], %s690_s1, %s690_s1, %s691_s16  }
  0x23   :  { %679 = dma.done.wait [#allocation4], 256  }
  0x24   :  { %680 = vsyncadd [#allocation4], 4294967040 }
  0x25   :  { %681 = dma.done.wait [#allocation7], 4096  }
  0x26   :  { %682 = vsyncadd [#allocation7], 4294963200  ;;  %v692_v0 = vmov 0   ;;  %v555_v1 = vld [vmem:[#allocation6 + $0x74] ss:$8 sps:$4 sm:$0xff]   ;;  %v583_v16 = vld [vmem:[#allocation8 + $0x68] sm:$0xff]   ;;  %v96_v36 = vlaneseq }
  0x27   :  { %218 = vmatprep.mubr.bf16.mxu0 %v692_v0  ;;  %v557_v2 = vld [vmem:[#allocation6 + $0x70] ss:$8 sps:$4 sm:$0xff]   ;;  %186 = vmatprep.subr.bf16.mxu0 %v555_v1  ;;  %v558_v3 = vld [vmem:[#allocation6 + $0x64] ss:$8 sps:$4 sm:$0xff]   ;;  %v560_v4 = vld [vmem:[#allocation6 + $0x60] ss:$8 sps:$4 sm:$0xff]  }
  0x28   :  { %187 = vmatpush1.bf16.msra.mxu0 %v557_v2  ;;  %v561_v5 = vld [vmem:[#allocation6 + $0x54] ss:$8 sps:$4 sm:$0xff]   ;;  %v563_v6 = vld [vmem:[#allocation6 + $0x50] ss:$8 sps:$4 sm:$0xff]   ;;  %v564_v7 = vld [vmem:[#allocation6 + $0x44] ss:$8 sps:$4 sm:$0xff]  }
  0x29   :  { %188 = vmatprep.subr.bf16.mxu0 %v558_v3  ;;  %v566_v8 = vld [vmem:[#allocation6 + $0x40] ss:$8 sps:$4 sm:$0xff]   ;;  %v567_v9 = vld [vmem:[#allocation6 + $0x34] ss:$8 sps:$4 sm:$0xff]   ;;  %v569_v11 = vld [vmem:[#allocation6 + $0x30] ss:$8 sps:$4 sm:$0xff]  }
  0x2a   :  { %v579_v10 = vld [vmem:[#allocation8 + $0x78] sm:$0xff]   ;;  %v570_v13 = vld [vmem:[#allocation6 + $0x24] ss:$8 sps:$4 sm:$0xff]   ;;  %v581_v14 = vld [vmem:[#allocation8 + $0x70] sm:$0xff]   ;;  %v97_v37 = vshrl.u32 %v96_v36, 7  ;;  %s693_s23 = smov [#allocation9]  }
  0x2b   :  { %v580_v12 = vld [vmem:[#allocation8 + $0x38] sm:$0xff]   ;;  %524 = vmatprep.subr.bf16.mxu1 %v579_v10  ;;  %v582_v15 = vld [vmem:[#allocation8 + $0x30] sm:$0xff]   ;;  %v572_v17 = vld [vmem:[#allocation6 + $0x20] ss:$8 sps:$4 sm:$0xff]   ;;  %s476_s24 = sshll.u32 %s693_s23, 4  ;;  %s477_s24 = int_to_ptr.vmem [resolvable:$true] %s476_s24 }
  0x2c   :  { %189 = vmatpush1.bf16.msra.mxu0 %v560_v4  ;;  %525 = vmatpush3.bf16.msra.mxu1 %v580_v12  ;;  %v573_v18 = vld [vmem:[#allocation6 + $0x14] ss:$8 sps:$4 sm:$0xff]   ;;  %v584_v19 = vld [vmem:[#allocation8 + $0x28] sm:$0xff]   ;;  %v585_v20 = vld [vmem:[#allocation8 + $0x60] sm:$0xff]   ;;  %v102_v38 = vsub.s32 1, %v97_v37  ;;  %v98_v39 = vsub.s32 0, %v97_v37  ;;  %p664_p2 = scmp.lt.s32.totalorder %s477_s24, %s477_s24 }
  0x2d   :  { %190 = vmatprep.subr.bf16.mxu0 %v561_v5  ;;  %526 = vmatprep.subr.bf16.mxu1 %v581_v14  ;;  %v575_v21 = vld [vmem:[#allocation6 + $0x10] ss:$8 sps:$4 sm:$0xff]   ;;  %v586_v22 = vld [vmem:[#allocation8 + $0x20] sm:$0xff]   ;;  %v591_v32 = vld [vmem:[#allocation8 + $0x48] sm:$0xff]   ;;  %s659_s25 = scalar_lea.vmem %s477_s24, 256 }
  0x2e   :  { %v576_v23 = vld [vmem:[#allocation6 + $0x4] ss:$8 sps:$4 sm:$0xff]   ;;  %v587_v24 = vld [vmem:[#allocation8 + $0x58] sm:$0xff]   ;;  %v578_v25 = vld [vmem:[#allocation6] ss:$8 sps:$4 sm:$0xff]   ;;  %p660_p1 = scmp.ne.s32.totalorder %s477_s24, %s659_s25  ;;  %p665_p3 = scmp.lt.s32.totalorder %s659_s25, %s659_s25 }
  0x2f   :  { %v75_v26 = vld [vmem:[#allocation3] sm:$0xff]  ;;  %v76_v27 = vld [vmem:[#allocation3 + $0x8] sm:$0xff]  ;;  %v592_v33 = vld [vmem:[#allocation8 + $0x8] sm:$0xff]  }
  0x30   :  { %191 = vmatpush1.bf16.msra.mxu0 %v563_v6  ;;  %527 = vmatpush3.bf16.msra.mxu1 %v582_v15  ;;  %v588_v28 = vld [vmem:[#allocation8 + $0x18] sm:$0xff]   ;;  %v77_v29 = vpack.c.bf16 %v76_v27, %v75_v26  ;;  %v589_v30 = vld [vmem:[#allocation8 + $0x50] sm:$0xff]   ;;  %v593_v34 = vld [vmem:[#allocation8 + $0x40] sm:$0xff]   ;;  %p666_p4 = por %p665_p3, %p664_p2 }
  0x31   :  { %192 = vmatprep.subr.bf16.mxu0 %v564_v7  ;;  %528 = vmatprep.subr.bf16.mxu1 %v583_v16  ;;  %v590_v31 = vld [vmem:[#allocation8 + $0x10] sm:$0xff]   ;;  %v594_v35 = vld [vmem:[#allocation8] sm:$0xff]  }
  0x32   :  { %v94_v40 = vld [vmem:[%s769_s2] sm:$0x3]  ;;  %p667_p5 = pnand %p666_p4, %p660_p1 }
  0x33   :  { %v103_v42 = vrot.slane %v94_v40, %v102_v38  ;;  %v99_v43 = vrot.slane %v94_v40, %v98_v39  ;;  %v521_v59 = vld [vmem:[%s771_s4] ss:$0 sm:$0xff] }
  0x34   :  { %193 = vmatpush1.bf16.msra.mxu0 %v566_v8  ;;  %529 = vmatpush3.bf16.msra.mxu1 %v584_v19  ;;  %v522_v19 = vld [vmem:[%s772_s5] ss:$0 sm:$0xff] }
  0x35   :  { %194 = vmatprep.subr.bf16.mxu0 %v567_v9  ;;  %530 = vmatprep.subr.bf16.mxu1 %v585_v20 }
  0x38   :  { %195 = vmatpush1.bf16.msra.mxu0 %v569_v11  ;;  %531 = vmatpush3.bf16.msra.mxu1 %v586_v22 }
  0x39   :  { %196 = vmatprep.subr.bf16.mxu0 %v570_v13  ;;  %532 = vmatprep.subr.bf16.mxu1 %v587_v24 }
  0x3c   :  { %197 = vmatpush1.bf16.msra.mxu0 %v572_v17  ;;  %533 = vmatpush3.bf16.msra.mxu1 %v588_v28 }
  0x3d   :  { %198 = vmatprep.subr.bf16.mxu0 %v573_v18  ;;  %534 = vmatprep.subr.bf16.mxu1 %v589_v30 }
  0x40   :  { %199 = vmatpush1.bf16.msra.mxu0 %v575_v21  ;;  %535 = vmatpush3.bf16.msra.mxu1 %v590_v31  ;;  %v523_v21 = vld [vmem:[%s773_s6] ss:$0 sm:$0xff] }
  0x41   :  { %200 = vmatprep.subr.bf16.mxu0 %v576_v23  ;;  %536 = vmatprep.subr.bf16.mxu1 %v591_v32 }
  0x44   :  { %201 = vmatpush1.bf16.msra.mxu0 %v578_v25  ;;  %537 = vmatpush3.bf16.msra.mxu1 %v592_v33 }
  0x45   :  { %538 = vmatprep.subr.bf16.mxu1 %v593_v34 }
  0x47   :  { %219 = vmatmul.mubr.bf16.vlgmr.msra.gmra.mxu0 %v77_v29 }
  0x48   :  { %539 = vmatpush3.bf16.msra.mxu1 %v594_v35 }
 0x107   :  { %v220_v41 = vpop.f32.mrf.mxu0 }
 0x108   :  { %v221_v48 = vadd.f32 %v220_v41, %v99_v43 }
 0x109   :  { %v222_v44 = vpop.f32.mrf.mxu0 }
 0x10a   :  { %v223_v46 = vadd.f32 %v222_v44, %v103_v42  ;;  %v229_v54 = vmax.f32 %v221_v48, 0.0 }
 0x10b   :  { %v224_v45 = vpop.f32.mrf.mxu0 }
 0x10c   :  { %v225_v47 = vadd.f32 %v224_v45, %v99_v43  ;;  %v230_v52 = vmax.f32 %v223_v46, 0.0 }
 0x10d   :  { %v226_v49 = vpop.f32.mrf.mxu0 }
 0x10e   :  { %v227_v50 = vadd.f32 %v226_v49, %v103_v42  ;;  %v231_v51 = vmax.f32 %v225_v47, 0.0 }
 0x110   :  { %v232_v53 = vmax.f32 %v227_v50, 0.0  ;;  %v235_v56 = vpack.c.bf16 %v231_v51, %v229_v54 }
 0x112   :  { %v236_v55 = vpack.c.bf16 %v232_v53, %v230_v52 }
 0x114   :  { %397 = vmatprep.mubr.bf16.mxu1 %v236_v55 }
 0x115   :  { %398 = vmatmul.mubr.bf16.vlgmr.msra.gmra.mxu1 %v235_v56 }
 0x1d5   :  { %v540_v57 = vpop.f32.mrf.mxu1 }
 0x1d7   :  { %v541_v58 = vpop.f32.mrf.mxu1 }
 0x1d8   :  { %v542_v60 = vadd.f32 %v541_v58, %v540_v57 }
 0x1d9   :  { %v543_v61 = vpop.f32.mrf.mxu1 }
 0x1da   :  { %v424_v62 = vadd.f32 %v542_v60, %v521_v59 }
 0x1db   :  { %v544_v63 = vpop.f32.mrf.mxu1 }
 0x1dc   :  { %v545_v0 = vadd.f32 %v544_v63, %v543_v61  ;;  %v426_v1 = vadd.f32 %v424_v62, %v75_v26 }
 0x1de   :  { %v425_v2 = vadd.f32 %v545_v0, %v521_v59  ;;  %428 = vadd.xlane.f32.xlu0 %v426_v1 }
 0x1e0   :  { %v427_v3 = vadd.f32 %v425_v2, %v76_v27 }
 0x1e2   :  { %430 = vadd.xlane.f32.xlu0 %v427_v3 }
 0x267   :  { %v429_v4 = vpop.xlane.xlu0 %428 }
 0x268   :  { %v433_v5 = vmul.f32 0.0078125, %v429_v4 }
 0x26a   :  { %v435_v6 = vsub.f32 %v426_v1, %v433_v5 }
 0x26b   :  { %v431_v7 = vpop.xlane.xlu0 %430 }
 0x26c   :  { %v434_v8 = vmul.f32 0.0078125, %v431_v7  ;;  %v437_v9 = vmul.f32 %v435_v6, %v435_v6 }
 0x26e   :  { %v436_v10 = vsub.f32 %v427_v3, %v434_v8  ;;  %439 = vadd.xlane.f32.xlu1 %v437_v9 }
 0x270   :  { %v438_v11 = vmul.f32 %v436_v10, %v436_v10 }
 0x272   :  { %441 = vadd.xlane.f32.xlu1 %v438_v11 }
 0x2f7   :  { %v440_v12 = vpop.xlane.xlu1 %439 }
 0x2f8   :  { %v443_v13 = vmul.f32 0.0078125, %v440_v12 }
 0x2fa   :  { %v445_v14 = vadd.f32 1e-06, %v443_v13 }
 0x2fb   :  { %v442_v15 = vpop.xlane.xlu1 %441 }
 0x2fc   :  { %595 = vrsqrt.f32 %v445_v14  ;;  %v444_v16 = vmul.f32 0.0078125, %v442_v15 }
 0x2fe   :  { %v446_v17 = vadd.f32 1e-06, %v444_v16 }
 0x300   :  { %597 = vrsqrt.f32 %v446_v17 }
 0x309   :  { %v596_v18 = vpop.eup %595 }
 0x30a   :  { %v449_v20 = vmul.f32 %v596_v18, %v435_v6 }
 0x30c   :  { %v458_v22 = vmul.f32 %v522_v19, %v449_v20 }
 0x30d   :  { %v598_v23 = vpop.eup %597 }
 0x30e   :  { %v450_v24 = vmul.f32 %v598_v23, %v436_v10  ;;  %v467_v25 = vadd.f32 %v523_v21, %v458_v22 }
 0x310   :  { %v459_v26 = vmul.f32 %v522_v19, %v450_v24  ;;  %469 = vst [vmem:[#allocation9] sm:$0xff] %v467_v25 }
 0x312   :  { %v468_v27 = vadd.f32 %v523_v21, %v459_v26 }
 0x314   :  { %470 = vst [vmem:[#allocation9 + $0x8] sm:$0xff] %v468_v27 }
 0x315   :  { %670 = shalt.err (!%p667_p5)
}
 0x316   :  { %482 = dma.vmem_to_hbm [thread:$0]  %s477_s24, 256, %s774_s7, [#allocation5], %s687_s29, %s687_s29, %s688_s30  }
 0x317   :  { %683 = dma.done.wait [#allocation5], 256  }
 0x318   :  { %684 = vsyncadd [#allocation5], 4294967040 }
 0x319   :  { %486 = vsyncpa [#allocation4], 1 }
 0x31a   :  { %487 = vsyncpa [#allocation7], 1 }
 0x31b   :  { %488 = vsyncpa [#allocation5], 1 }

</bundles_post_ra>
